<compile_context>
chip_gen: v5e
topology: v5e:2x2
jax: 0.10.0
libtpu: 0.0.40
codegen_flags: <defaults>
</compile_context>

<pallas_src>
import jax
import jax.numpy as jnp
from jax.experimental import pallas as pl
from jax.experimental.pallas import tpu as pltpu

D = 16        # n_features
M = 32        # hidden_layer_units[0]
DM = D * M    # 512 -> lane-dense (4 x 128 lanes)
EPS = 0.01    # nonlinear_clamp -> LayerNorm eps


def notears_mlp_kernel(x_ref, w_ref, rhs_ref, smean_ref, wsum_ref, o_ref):
    x = x_ref[...]                                                          # [bt, D]
    # dag_layer: one fused MXU matmul -> lane-dense [bt, D*M]
    y = jnp.dot(x, w_ref[...], preferred_element_type=jnp.float32)
    z = jax.nn.sigmoid(y)                                                   # single EUP pass

    # Group reductions over the hidden dim M via the MXU (block-diagonal RHS).
    # rhs = [s_mean | s_wloc]: one push yields the per-feature mean and the
    # LocallyConnected weighted sum together; the z^2 push is independent.
    red = jnp.dot(z, rhs_ref[...], preferred_element_type=jnp.float32)      # [bt, 2D]
    ez2 = jnp.dot(z * z, smean_ref[...], preferred_element_type=jnp.float32)  # [bt, D]

    mu = red[:, :D]                                                         # E[z]
    s3 = red[:, D:]                                                         # sum_k z*wloc
    var = ez2 - mu * mu                                                     # biased var (PyTorch LN)
    inv_std = jax.lax.rsqrt(var + EPS)
    # LN(z) @ wloc == inv_std * (S3 - mu * sum_k wloc)   (gamma=1, beta=0)
    o_ref[...] = inv_std * (s3 - mu * wsum_ref[...])                        # [bt, D]


def _default_batch_tile(n_batch: int) -> int:
    if n_batch <= 8:
        return n_batch
    bt = min(n_batch, 512)               # VMEM cap (v5e 16 MiB scoped / v7x 64 MiB)
    if (n_batch + bt - 1) // bt < 2:     # >=2 grid steps so v7x's 2nd TC gets work
        bt = (n_batch + 1) // 2
    return max(8, ((bt + 7) // 8) * 8)   # f32 sublane multiple


def _precompute_params(w_dag, w_loc):
    """Host-side glue (ideally done once at parameter-setup time)."""
    w_all = w_dag.T                                                         # [D, DM]
    group = jnp.arange(DM, dtype=jnp.int32) // M
    onehot = (group[:, None] == jnp.arange(D, dtype=jnp.int32)[None, :]
              ).astype(jnp.float32)                                         # [DM, D] block-diag 1s
    s_mean = onehot * jnp.float32(1.0 / M)                                  # group-mean matrix
    s_wloc = onehot * w_loc[..., 0].reshape(DM)[:, None]                    # LC weights folded in
    rhs = jnp.concatenate([s_mean, s_wloc], axis=1)                         # [DM, 2D]
    wsum = jnp.sum(w_loc[..., 0], axis=-1).reshape(1, D)                    # per-feature LC weight sum
    return w_all, rhs, s_mean, wsum


def notears_mlp_forward(x, w_dag, w_loc, *, batch_tile=None):
    """x: [B, D]; w_dag: torch layout [D*M, D]; w_loc: [D, M, 1] -> [B, D]."""
    n_batch = x.shape[0]
    bt = _default_batch_tile(n_batch) if batch_tile is None else batch_tile
    w_all, rhs, s_mean, wsum = _precompute_params(w_dag, w_loc)
    # TODO(synk): use_bias=True variant (dag bias [D*M], loc bias [D,1]) not wired in;
    #             the module default is use_bias=False.
    return pl.pallas_call(
        notears_mlp_kernel,
        out_shape=jax.ShapeDtypeStruct((n_batch, D), jnp.float32),
        grid=(pl.cdiv(n_batch, bt),),
        in_specs=[
            pl.BlockSpec((bt, D), lambda b: (b, 0)),        # x, tiled over batch
            pl.BlockSpec((D, DM), lambda b: (0, 0)),        # fused dag weight (w_dag.T)
            pl.BlockSpec((DM, 2 * D), lambda b: (0, 0)),    # [s_mean | s_wloc] reduction RHS
            pl.BlockSpec((DM, D), lambda b: (0, 0)),        # s_mean (for the z^2 branch)
            pl.BlockSpec((1, D), lambda b: (0, 0)),         # per-feature LC weight sums
        ],
        out_specs=pl.BlockSpec((bt, D), lambda b: (b, 0)),
        compiler_params=pltpu.CompilerParams(dimension_semantics=("parallel",)),
    )(x, w_all, rhs, s_mean, wsum)


def notears_mlp_reference(x, w_dag, w_loc):
    """Pure-JAX reference mirroring the PyTorch forward exactly."""
    y = (x @ w_dag.T).reshape(-1, D, M)                                     # view(-1, dims[0], dims[1])
    z = jax.nn.sigmoid(y)
    mu = jnp.mean(z, axis=-1, keepdims=True)
    var = jnp.mean(jnp.square(z - mu), axis=-1, keepdims=True)              # biased var (PyTorch LN)
    ln = (z - mu) / jnp.sqrt(var + EPS)
    return jnp.einsum("bjk,jko->bjo", ln, w_loc)[..., 0]                    # LocallyConnected + squeeze(2)


if __name__ == "__main__":
    key = jax.random.PRNGKey(0)
    kx, kd, kl = jax.random.split(key, 3)
    B = 8
    x = jax.random.normal(kx, (B, D), dtype=jnp.float32)
    # Synthetic deterministic parameters (module zero-inits the dag weight before
    # fitting; small random values exercise the kernel path non-trivially).
    w_dag = 0.1 * jax.random.normal(kd, (DM, D), dtype=jnp.float32)         # dag_layer.weight
    w_loc = 0.1 * jax.random.normal(kl, (D, M, 1), dtype=jnp.float32)       # LocallyConnected.weight

    out = jax.block_until_ready(notears_mlp_forward(x, w_dag, w_loc))
    ref = notears_mlp_reference(x, w_dag, w_loc)
    assert out.shape == (B, D)
    assert jnp.allclose(out, ref, atol=1e-4, rtol=1e-4), float(jnp.max(jnp.abs(out - ref)))

    # Multi-tile grid path (exercises batch tiling / megacore split).
    B2 = 32
    x2 = jax.random.normal(kx, (B2, D), dtype=jnp.float32)
    out2 = jax.block_until_ready(notears_mlp_forward(x2, w_dag, w_loc))
    ref2 = notears_mlp_reference(x2, w_dag, w_loc)
    assert jnp.allclose(out2, ref2, atol=1e-4, rtol=1e-4), float(jnp.max(jnp.abs(out2 - ref2)))

    print("KERNEL_OK")
</pallas_src>

<mosaic_0001>
module attributes {stable_mosaic.version = 11 : i64} {
  func.func @notears_mlp_kernel(%arg0: i32, %arg1: memref<8x16xf32, #tpu.memory_space<vmem>>, %arg2: memref<16x512xf32, #tpu.memory_space<vmem>>, %arg3: memref<512x32xf32, #tpu.memory_space<vmem>>, %arg4: memref<512x16xf32, #tpu.memory_space<vmem>>, %arg5: memref<1x16xf32, #tpu.memory_space<vmem>>, %arg6: memref<8x16xf32, #tpu.memory_space<vmem>>) attributes {dimension_semantics = [#tpu.dimension_semantics<parallel>], iteration_bounds = array<i64: 1>, scalar_prefetch = 0 : i64, scratch_operands = 0 : i64, tpu.core_type = #tpu.core_type<tc>, window_params = [{transform_indices = @transform_0, window_bounds = array<i64: 8, 16>}, {pipeline_mode = #tpu.pipeline_mode<synchronous>, transform_indices = @transform_1, window_bounds = array<i64: 16, 512>}, {pipeline_mode = #tpu.pipeline_mode<synchronous>, transform_indices = @transform_2, window_bounds = array<i64: 512, 32>}, {pipeline_mode = #tpu.pipeline_mode<synchronous>, transform_indices = @transform_3, window_bounds = array<i64: 512, 16>}, {pipeline_mode = #tpu.pipeline_mode<synchronous>, transform_indices = @transform_4, window_bounds = array<i64: 1, 16>}, {transform_indices = @transform_5, window_bounds = array<i64: 8, 16>}]} {
    %c0 = arith.constant 0 : index
    %c0_0 = arith.constant 0 : index
    %0 = vector.load %arg1[%c0, %c0_0] : memref<8x16xf32, #tpu.memory_space<vmem>>, vector<8x16xf32>
    %c0_1 = arith.constant 0 : index
    %c0_2 = arith.constant 0 : index
    %1 = vector.load %arg2[%c0_1, %c0_2] : memref<16x512xf32, #tpu.memory_space<vmem>>, vector<16x512xf32>
    %cst = arith.constant dense<0.000000e+00> : vector<8x512xf32>
    %2 = tpu.matmul %0, %1, %cst {dimension_numbers = #tpu.dot_dimension_numbers<[1], [0], [0], [1], [0, 0, 1, 1], [], []>} : vector<8x16xf32>, vector<16x512xf32>, vector<8x512xf32> -> vector<8x512xf32>
    %3 = arith.negf %2 : vector<8x512xf32>
    %4 = math.exp %3 : vector<8x512xf32>
    %cst_3 = arith.constant 1.000000e+00 : f32
    %5 = vector.broadcast %cst_3 : f32 to vector<8x512xf32>
    %6 = arith.addf %5, %4 : vector<8x512xf32>
    %7 = arith.divf %5, %6 : vector<8x512xf32>
    %c0_4 = arith.constant 0 : index
    %c0_5 = arith.constant 0 : index
    %8 = vector.load %arg3[%c0_4, %c0_5] : memref<512x32xf32, #tpu.memory_space<vmem>>, vector<512x32xf32>
    %cst_6 = arith.constant dense<0.000000e+00> : vector<8x32xf32>
    %9 = tpu.matmul %7, %8, %cst_6 {dimension_numbers = #tpu.dot_dimension_numbers<[1], [0], [0], [1], [0, 0, 1, 1], [], []>} : vector<8x512xf32>, vector<512x32xf32>, vector<8x32xf32> -> vector<8x32xf32>
    %10 = arith.mulf %7, %7 : vector<8x512xf32>
    %c0_7 = arith.constant 0 : index
    %c0_8 = arith.constant 0 : index
    %11 = vector.load %arg4[%c0_7, %c0_8] : memref<512x16xf32, #tpu.memory_space<vmem>>, vector<512x16xf32>
    %cst_9 = arith.constant dense<0.000000e+00> : vector<8x16xf32>
    %12 = tpu.matmul %10, %11, %cst_9 {dimension_numbers = #tpu.dot_dimension_numbers<[1], [0], [0], [1], [0, 0, 1, 1], [], []>} : vector<8x512xf32>, vector<512x16xf32>, vector<8x16xf32> -> vector<8x16xf32>
    %13 = vector.extract_strided_slice %9 {offsets = [0, 0], sizes = [8, 16], strides = [1, 1]} : vector<8x32xf32> to vector<8x16xf32>
    %14 = vector.extract_strided_slice %9 {offsets = [0, 16], sizes = [8, 16], strides = [1, 1]} : vector<8x32xf32> to vector<8x16xf32>
    %15 = arith.mulf %13, %13 : vector<8x16xf32>
    %16 = arith.subf %12, %15 : vector<8x16xf32>
    %cst_10 = arith.constant 0.00999999977 : f32
    %17 = vector.broadcast %cst_10 : f32 to vector<8x16xf32>
    %18 = arith.addf %16, %17 : vector<8x16xf32>
    %19 = math.rsqrt %18 : vector<8x16xf32>
    %c0_11 = arith.constant 0 : index
    %c0_12 = arith.constant 0 : index
    %20 = vector.load %arg5[%c0_11, %c0_12] : memref<1x16xf32, #tpu.memory_space<vmem>>, vector<1x16xf32>
    %21 = vector.broadcast %20 : vector<1x16xf32> to vector<8x16xf32>
    %22 = arith.mulf %13, %21 : vector<8x16xf32>
    %23 = arith.subf %14, %22 : vector<8x16xf32>
    %24 = arith.mulf %19, %23 : vector<8x16xf32>
    %c0_13 = arith.constant 0 : index
    %c0_14 = arith.constant 0 : index
    %25 = vector.load %arg6[%c0_13, %c0_14] : memref<8x16xf32, #tpu.memory_space<vmem>>, vector<8x16xf32>
    tpu.vector_store %arg6[%c0_13, %c0_14], %24 {strides = array<i32>} : memref<8x16xf32, #tpu.memory_space<vmem>>, vector<8x16xf32>,
    return
  }
  func.func @transform_0(%arg0: i32) -> (i32, i32) {
    %c0_i32 = arith.constant 0 : i32
    %c0_i32_0 = arith.constant 0 : i32
    return %arg0, %c0_i32 : i32, i32
  }
  func.func @transform_1(%arg0: i32) -> (i32, i32) {
    %c0_i32 = arith.constant 0 : i32
    %c0_i32_0 = arith.constant 0 : i32
    %c0_i32_1 = arith.constant 0 : i32
    return %c0_i32, %c0_i32_0 : i32, i32
  }
  func.func @transform_2(%arg0: i32) -> (i32, i32) {
    %c0_i32 = arith.constant 0 : i32
    %c0_i32_0 = arith.constant 0 : i32
    %c0_i32_1 = arith.constant 0 : i32
    return %c0_i32, %c0_i32_0 : i32, i32
  }
  func.func @transform_3(%arg0: i32) -> (i32, i32) {
    %c0_i32 = arith.constant 0 : i32
    %c0_i32_0 = arith.constant 0 : i32
    %c0_i32_1 = arith.constant 0 : i32
    return %c0_i32, %c0_i32_0 : i32, i32
  }
  func.func @transform_4(%arg0: i32) -> (i32, i32) {
    %c0_i32 = arith.constant 0 : i32
    %c0_i32_0 = arith.constant 0 : i32
    %c0_i32_1 = arith.constant 0 : i32
    return %c0_i32, %c0_i32_0 : i32, i32
  }
  func.func @transform_5(%arg0: i32) -> (i32, i32) {
    %c0_i32 = arith.constant 0 : i32
    %c0_i32_0 = arith.constant 0 : i32
    return %arg0, %c0_i32 : i32, i32
  }
}

</mosaic_0001>

<bundles_post_ra>
// kernel: tpu_custom_call.1
= control target key start
LH: loop header
LB: loop body
LE: loop exit
PB: predicated region body
PF: predicated region fallthrough
CT: control target
= control target key end

     0   :  { %vm30_vm0 = vcmask 130048   ;;  %s1038_s0 = inlined_call_operand.vmem [shape: f32[8,16], index: 0, kind: input, shape index: {}]   ;;  %s1039_s1 = inlined_call_operand.vmem [shape: f32[16,512], index: 1, kind: input, shape index: {}]   ;;  %s1040_s2 = inlined_call_operand.vmem [shape: f32[512,32], index: 2, kind: input, shape index: {}]   ;;  %s1041_s3 = inlined_call_operand.vmem [shape: f32[512,16], index: 3, kind: input, shape index: {}]   ;;  %s1042_s4 = inlined_call_operand.vmem [shape: f32[1,16], index: 4, kind: input, shape index: {}]   ;;  %s1043_s5 = inlined_call_operand.hbm [shape: f32[8,16], index: 5, kind: output, shape index: {}]  }
   0x1   :  { %v26_v0 = vld [vmem:[%s1039_s1 + $0x20] sm:$0xff]  ;;  %v27_v1 = vld [vmem:[%s1039_s1 + $0x28] sm:$0xff]  ;;  %v28_v2 = vld [vmem:[%s1039_s1 + $0x30] sm:$0xff] }
   0x2   :  { %48 = vmatpush.msra.mxu0 %v26_v0  ;;  %68 = vmatpush.msra.mxu1 %v27_v1  ;;  %v29_v3 = vld [vmem:[%s1039_s1 + $0x38] sm:$0xff]  ;;  %v22_v4 = vld [vmem:[%s1039_s1] sm:$0xff]  ;;  %v23_v5 = vld [vmem:[%s1039_s1 + $0x8] sm:$0xff] }
   0x3   :  { %88 = vmatpush.msra.mxu2 %v28_v2  ;;  %108 = vmatpush.msra.mxu3 %v29_v3  ;;  %v24_v6 = vld [vmem:[%s1039_s1 + $0x10] sm:$0xff]  ;;  %v25_v7 = vld [vmem:[%s1039_s1 + $0x18] sm:$0xff]  ;;  %v21_v8 = vld [vmem:[%s1038_s0] sm:$0xff] }
   0x4   :  { %49 = vmatpush.msra.mxu0 %v22_v4  ;;  %69 = vmatpush.msra.mxu1 %v23_v5  ;;  %v205_v9 = vld [vmem:[%s1040_s2 + $0x78] sm:$0xff]  ;;  %v204_v12 = vld [vmem:[%s1040_s2 + $0x70] sm:$0xff]  ;;  %v203_v17 = vld [vmem:[%s1040_s2 + $0x68] sm:$0xff] }
   0x5   :  { %89 = vmatpush.msra.mxu2 %v24_v6  ;;  %109 = vmatpush.msra.mxu3 %v25_v7  ;;  %v221_v10 = vld [vmem:[%s1040_s2 + $0xf8] sm:$0xff]  ;;  %v220_v13 = vld [vmem:[%s1040_s2 + $0xf0] sm:$0xff]  ;;  %v219_v18 = vld [vmem:[%s1040_s2 + $0xe8] sm:$0xff] }
   0x6   :  { %527 = vmatmul.msk.f32.vlgmr.msra.gmra.mxu0 %vm30_vm0, %v21_v8  ;;  %528 = vmatmul.msk.f32.vlgmr.msra.gmra.mxu1 %vm30_vm0, %v21_v8  ;;  %v237_v11 = vld [vmem:[%s1040_s2 + $0x178] sm:$0xff]  ;;  %v236_v15 = vld [vmem:[%s1040_s2 + $0x170] sm:$0xff]  ;;  %v235_v19 = vld [vmem:[%s1040_s2 + $0x168] sm:$0xff] }
   0x7   :  { %529 = vmatmul.msk.f32.vlgmr.msra.gmra.mxu2 %vm30_vm0, %v21_v8  ;;  %530 = vmatmul.msk.f32.vlgmr.msra.gmra.mxu3 %vm30_vm0, %v21_v8  ;;  %v253_v14 = vld [vmem:[%s1040_s2 + $0x1f8] sm:$0xff]  ;;  %v252_v16 = vld [vmem:[%s1040_s2 + $0x1f0] sm:$0xff]  ;;  %v251_v20 = vld [vmem:[%s1040_s2 + $0x1e8] sm:$0xff] }
   0x8   :  { %254 = vmatpush.msrb.mxu0 %v205_v9  ;;  %274 = vmatpush.msrb.mxu1 %v221_v10  ;;  %v202_v21 = vld [vmem:[%s1040_s2 + $0x60] sm:$0xff]  ;;  %v201_v25 = vld [vmem:[%s1040_s2 + $0x58] sm:$0xff]  ;;  %v200_v29 = vld [vmem:[%s1040_s2 + $0x50] sm:$0xff] }
   0x9   :  { %294 = vmatpush.msrb.mxu2 %v237_v11  ;;  %314 = vmatpush.msrb.mxu3 %v253_v14  ;;  %v218_v22 = vld [vmem:[%s1040_s2 + $0xe0] sm:$0xff]  ;;  %v217_v26 = vld [vmem:[%s1040_s2 + $0xd8] sm:$0xff]  ;;  %v216_v30 = vld [vmem:[%s1040_s2 + $0xd0] sm:$0xff] }
   0xa   :  { %255 = vmatpush.msrb.mxu0 %v204_v12  ;;  %275 = vmatpush.msrb.mxu1 %v220_v13  ;;  %v234_v23 = vld [vmem:[%s1040_s2 + $0x160] sm:$0xff]  ;;  %v233_v27 = vld [vmem:[%s1040_s2 + $0x158] sm:$0xff]  ;;  %v232_v31 = vld [vmem:[%s1040_s2 + $0x150] sm:$0xff] }
   0xb   :  { %295 = vmatpush.msrb.mxu2 %v236_v15  ;;  %315 = vmatpush.msrb.mxu3 %v252_v16  ;;  %v250_v24 = vld [vmem:[%s1040_s2 + $0x1e0] sm:$0xff]  ;;  %v249_v28 = vld [vmem:[%s1040_s2 + $0x1d8] sm:$0xff]  ;;  %v248_v32 = vld [vmem:[%s1040_s2 + $0x1d0] sm:$0xff] }
   0xc   :  { %256 = vmatpush.msrb.mxu0 %v203_v17  ;;  %276 = vmatpush.msrb.mxu1 %v219_v18  ;;  %v199_v33 = vld [vmem:[%s1040_s2 + $0x48] sm:$0xff]  ;;  %v198_v35 = vld [vmem:[%s1040_s2 + $0x40] sm:$0xff] }
   0xd   :  { %296 = vmatpush.msrb.mxu2 %v235_v19  ;;  %316 = vmatpush.msrb.mxu3 %v251_v20  ;;  %v215_v34 = vld [vmem:[%s1040_s2 + $0xc8] sm:$0xff]  ;;  %v214_v38 = vld [vmem:[%s1040_s2 + $0xc0] sm:$0xff] }
   0xe   :  { %257 = vmatpush.msrb.mxu0 %v202_v21  ;;  %277 = vmatpush.msrb.mxu1 %v218_v22  ;;  %v231_v36 = vld [vmem:[%s1040_s2 + $0x148] sm:$0xff] }
   0xf   :  { %297 = vmatpush.msrb.mxu2 %v234_v23  ;;  %317 = vmatpush.msrb.mxu3 %v250_v24  ;;  %v247_v37 = vld [vmem:[%s1040_s2 + $0x1c8] sm:$0xff] }
  0x10   :  { %258 = vmatpush.msrb.mxu0 %v201_v25  ;;  %278 = vmatpush.msrb.mxu1 %v217_v26 }
  0x11   :  { %298 = vmatpush.msrb.mxu2 %v233_v27  ;;  %318 = vmatpush.msrb.mxu3 %v249_v28 }
  0x12   :  { %259 = vmatpush.msrb.mxu0 %v200_v29  ;;  %279 = vmatpush.msrb.mxu1 %v216_v30 }
  0x13   :  { %299 = vmatpush.msrb.mxu2 %v232_v31  ;;  %319 = vmatpush.msrb.mxu3 %v248_v32 }
  0x14   :  { %10 = vsyncpa [#allocation3], 0  ;;  %260 = vmatpush.msrb.mxu0 %v199_v33  ;;  %280 = vmatpush.msrb.mxu1 %v215_v34  ;;  %v230_v39 = vld [vmem:[%s1040_s2 + $0x140] sm:$0xff]  ;;  %v197_v41 = vld [vmem:[%s1040_s2 + $0x38] sm:$0xff]  ;;  %s583_s19 = smov 16   ;;  %s584_s20 = smov 112  }
  0x15   :  { %v246_v40 = vld [vmem:[%s1040_s2 + $0x1c0] sm:$0xff]  ;;  %v213_v42 = vld [vmem:[%s1040_s2 + $0xb8] sm:$0xff]  ;;  %300 = vmatpush.msrb.mxu2 %v231_v36  ;;  %320 = vmatpush.msrb.mxu3 %v247_v37  ;;  %v196_v45 = vld [vmem:[%s1040_s2 + $0x30] sm:$0xff]  ;;  %s518_s23 = sshll.u32 %s1043_s5, 4  ;;  %s519_s23 = int_to_ptr.hbm [resolvable:$true] %s518_s23 }
  0x16   :  { %261 = vmatpush.msrb.mxu0 %v198_v35  ;;  %281 = vmatpush.msrb.mxu1 %v214_v38  ;;  %v229_v43 = vld [vmem:[%s1040_s2 + $0x138] sm:$0xff]  ;;  %v212_v46 = vld [vmem:[%s1040_s2 + $0xb0] sm:$0xff]  ;;  %v195_v49 = vld [vmem:[%s1040_s2 + $0x28] sm:$0xff] }
  0x17   :  { %v245_v44 = vld [vmem:[%s1040_s2 + $0x1b8] sm:$0xff]  ;;  %301 = vmatpush.msrb.mxu2 %v230_v39  ;;  %321 = vmatpush.msrb.mxu3 %v246_v40  ;;  %v228_v47 = vld [vmem:[%s1040_s2 + $0x130] sm:$0xff]  ;;  %v211_v50 = vld [vmem:[%s1040_s2 + $0xa8] sm:$0xff] }
  0x18   :  { %262 = vmatpush.msrb.mxu0 %v197_v41  ;;  %282 = vmatpush.msrb.mxu1 %v213_v42  ;;  %v244_v48 = vld [vmem:[%s1040_s2 + $0x1b0] sm:$0xff]  ;;  %v194_v51 = vld [vmem:[%s1040_s2 + $0x20] sm:$0xff]  ;;  %v193_v53 = vld [vmem:[%s1040_s2 + $0x18] sm:$0xff] }
  0x19   :  { %302 = vmatpush.msrb.mxu2 %v229_v43  ;;  %322 = vmatpush.msrb.mxu3 %v245_v44  ;;  %v210_v52 = vld [vmem:[%s1040_s2 + $0xa0] sm:$0xff]  ;;  %v209_v54 = vld [vmem:[%s1040_s2 + $0x98] sm:$0xff]  ;;  %v192_v55 = vld [vmem:[%s1040_s2 + $0x10] sm:$0xff] }
  0x1a   :  { %263 = vmatpush.msrb.mxu0 %v196_v45  ;;  %283 = vmatpush.msrb.mxu1 %v212_v46  ;;  %v208_v56 = vld [vmem:[%s1040_s2 + $0x90] sm:$0xff]  ;;  %v227_v57 = vld [vmem:[%s1040_s2 + $0x128] sm:$0xff]  ;;  %v226_v61 = vld [vmem:[%s1040_s2 + $0x120] sm:$0xff] }
  0x1b   :  { %303 = vmatpush.msrb.mxu2 %v228_v47  ;;  %323 = vmatpush.msrb.mxu3 %v244_v48  ;;  %v243_v58 = vld [vmem:[%s1040_s2 + $0x1a8] sm:$0xff]  ;;  %v242_v62 = vld [vmem:[%s1040_s2 + $0x1a0] sm:$0xff]  ;;  %v225_v1 = vld [vmem:[%s1040_s2 + $0x118] sm:$0xff] }
  0x1c   :  { %264 = vmatpush.msrb.mxu0 %v195_v49  ;;  %284 = vmatpush.msrb.mxu1 %v211_v50  ;;  %v191_v59 = vld [vmem:[%s1040_s2 + $0x8] sm:$0xff]  ;;  %v190_v63 = vld [vmem:[%s1040_s2] sm:$0xff]  ;;  %v241_v2 = vld [vmem:[%s1040_s2 + $0x198] sm:$0xff] }
  0x1d   :  { %304 = vmatpush.msrb.mxu2 %v227_v57  ;;  %324 = vmatpush.msrb.mxu3 %v243_v58  ;;  %v207_v60 = vld [vmem:[%s1040_s2 + $0x88] sm:$0xff]  ;;  %v206_v0 = vld [vmem:[%s1040_s2 + $0x80] sm:$0xff]  ;;  %v353_v3 = vld [vmem:[%s1041_s3 + $0x78] sm:$0xff] }
  0x1e   :  { %265 = vmatpush.msrb.mxu0 %v194_v51  ;;  %285 = vmatpush.msrb.mxu1 %v210_v52  ;;  %v369_v4 = vld [vmem:[%s1041_s3 + $0xf8] sm:$0xff]  ;;  %v224_v5 = vld [vmem:[%s1040_s2 + $0x110] sm:$0xff]  ;;  %v223_v9 = vld [vmem:[%s1040_s2 + $0x108] sm:$0xff] }
  0x1f   :  { %305 = vmatpush.msrb.mxu2 %v226_v61  ;;  %325 = vmatpush.msrb.mxu3 %v242_v62  ;;  %v240_v6 = vld [vmem:[%s1040_s2 + $0x190] sm:$0xff]  ;;  %v239_v10 = vld [vmem:[%s1040_s2 + $0x188] sm:$0xff]  ;;  %v222_v13 = vld [vmem:[%s1040_s2 + $0x100] sm:$0xff] }
  0x20   :  { %266 = vmatpush.msrb.mxu0 %v193_v53  ;;  %286 = vmatpush.msrb.mxu1 %v209_v54  ;;  %v352_v7 = vld [vmem:[%s1041_s3 + $0x70] sm:$0xff]  ;;  %v351_v11 = vld [vmem:[%s1041_s3 + $0x68] sm:$0xff]  ;;  %v238_v14 = vld [vmem:[%s1040_s2 + $0x180] sm:$0xff] }
  0x21   :  { %306 = vmatpush.msrb.mxu2 %v225_v1  ;;  %326 = vmatpush.msrb.mxu3 %v241_v2  ;;  %v368_v8 = vld [vmem:[%s1041_s3 + $0xf0] sm:$0xff]  ;;  %v367_v12 = vld [vmem:[%s1041_s3 + $0xe8] sm:$0xff]  ;;  %v350_v15 = vld [vmem:[%s1041_s3 + $0x60] sm:$0xff] }
  0x22   :  { %267 = vmatpush.msrb.mxu0 %v192_v55  ;;  %287 = vmatpush.msrb.mxu1 %v208_v56  ;;  %v366_v16 = vld [vmem:[%s1041_s3 + $0xe0] sm:$0xff]  ;;  %v385_v17 = vld [vmem:[%s1041_s3 + $0x178] sm:$0xff]  ;;  %v384_v21 = vld [vmem:[%s1041_s3 + $0x170] sm:$0xff] }
  0x23   :  { %307 = vmatpush.msrb.mxu2 %v224_v5  ;;  %327 = vmatpush.msrb.mxu3 %v240_v6  ;;  %v401_v18 = vld [vmem:[%s1041_s3 + $0x1f8] sm:$0xff]  ;;  %v400_v22 = vld [vmem:[%s1041_s3 + $0x1f0] sm:$0xff]  ;;  %v383_v25 = vld [vmem:[%s1041_s3 + $0x168] sm:$0xff] }
  0x24   :  { %268 = vmatpush.msrb.mxu0 %v191_v59  ;;  %288 = vmatpush.msrb.mxu1 %v207_v60  ;;  %v349_v19 = vld [vmem:[%s1041_s3 + $0x58] sm:$0xff]  ;;  %v348_v23 = vld [vmem:[%s1041_s3 + $0x50] sm:$0xff]  ;;  %v399_v26 = vld [vmem:[%s1041_s3 + $0x1e8] sm:$0xff] }
  0x25   :  { %308 = vmatpush.msrb.mxu2 %v223_v9  ;;  %328 = vmatpush.msrb.mxu3 %v239_v10  ;;  %v365_v20 = vld [vmem:[%s1041_s3 + $0xd8] sm:$0xff]  ;;  %v364_v24 = vld [vmem:[%s1041_s3 + $0xd0] sm:$0xff]  ;;  %v347_v27 = vld [vmem:[%s1041_s3 + $0x48] sm:$0xff] }
  0x26   :  { %269 = vmatpush.msrb.mxu0 %v190_v63  ;;  %289 = vmatpush.msrb.mxu1 %v206_v0  ;;  %v363_v28 = vld [vmem:[%s1041_s3 + $0xc8] sm:$0xff]  ;;  %v382_v29 = vld [vmem:[%s1041_s3 + $0x160] sm:$0xff]  ;;  %v381_v33 = vld [vmem:[%s1041_s3 + $0x158] sm:$0xff] }
  0x27   :  { %309 = vmatpush.msrb.mxu2 %v222_v13  ;;  %329 = vmatpush.msrb.mxu3 %v238_v14  ;;  %v398_v30 = vld [vmem:[%s1041_s3 + $0x1e0] sm:$0xff]  ;;  %v397_v34 = vld [vmem:[%s1041_s3 + $0x1d8] sm:$0xff]  ;;  %v380_v37 = vld [vmem:[%s1041_s3 + $0x150] sm:$0xff] }
  0x28   :  { %402 = vmatpush.msra.mxu0 %v353_v3  ;;  %422 = vmatpush.msra.mxu1 %v369_v4  ;;  %v346_v31 = vld [vmem:[%s1041_s3 + $0x40] sm:$0xff]  ;;  %v345_v35 = vld [vmem:[%s1041_s3 + $0x38] sm:$0xff]  ;;  %v396_v38 = vld [vmem:[%s1041_s3 + $0x1d0] sm:$0xff] }
  0x29   :  { %442 = vmatpush.msra.mxu2 %v385_v17  ;;  %462 = vmatpush.msra.mxu3 %v401_v18  ;;  %v362_v32 = vld [vmem:[%s1041_s3 + $0xc0] sm:$0xff]  ;;  %v361_v36 = vld [vmem:[%s1041_s3 + $0xb8] sm:$0xff]  ;;  %v344_v39 = vld [vmem:[%s1041_s3 + $0x30] sm:$0xff] }
  0x2a   :  { %403 = vmatpush.msra.mxu0 %v352_v7  ;;  %423 = vmatpush.msra.mxu1 %v368_v8  ;;  %v360_v40 = vld [vmem:[%s1041_s3 + $0xb0] sm:$0xff]  ;;  %v379_v41 = vld [vmem:[%s1041_s3 + $0x148] sm:$0xff]  ;;  %v378_v45 = vld [vmem:[%s1041_s3 + $0x140] sm:$0xff] }
  0x2b   :  { %443 = vmatpush.msra.mxu2 %v384_v21  ;;  %463 = vmatpush.msra.mxu3 %v400_v22  ;;  %v395_v42 = vld [vmem:[%s1041_s3 + $0x1c8] sm:$0xff]  ;;  %v394_v46 = vld [vmem:[%s1041_s3 + $0x1c0] sm:$0xff]  ;;  %v377_v49 = vld [vmem:[%s1041_s3 + $0x138] sm:$0xff] }
  0x2c   :  { %404 = vmatpush.msra.mxu0 %v351_v11  ;;  %424 = vmatpush.msra.mxu1 %v367_v12  ;;  %v343_v43 = vld [vmem:[%s1041_s3 + $0x28] sm:$0xff]  ;;  %v342_v47 = vld [vmem:[%s1041_s3 + $0x20] sm:$0xff]  ;;  %v393_v50 = vld [vmem:[%s1041_s3 + $0x1b8] sm:$0xff] }
  0x2d   :  { %444 = vmatpush.msra.mxu2 %v383_v25  ;;  %464 = vmatpush.msra.mxu3 %v399_v26  ;;  %v359_v44 = vld [vmem:[%s1041_s3 + $0xa8] sm:$0xff]  ;;  %v358_v48 = vld [vmem:[%s1041_s3 + $0xa0] sm:$0xff]  ;;  %v341_v51 = vld [vmem:[%s1041_s3 + $0x18] sm:$0xff] }
  0x2e   :  { %405 = vmatpush.msra.mxu0 %v350_v15  ;;  %425 = vmatpush.msra.mxu1 %v366_v16  ;;  %v357_v52 = vld [vmem:[%s1041_s3 + $0x98] sm:$0xff]  ;;  %v376_v53 = vld [vmem:[%s1041_s3 + $0x130] sm:$0xff]  ;;  %v375_v59 = vld [vmem:[%s1041_s3 + $0x128] sm:$0xff] }
  0x2f   :  { %445 = vmatpush.msra.mxu2 %v382_v29  ;;  %465 = vmatpush.msra.mxu3 %v398_v30  ;;  %v392_v54 = vld [vmem:[%s1041_s3 + $0x1b0] sm:$0xff]  ;;  %v391_v60 = vld [vmem:[%s1041_s3 + $0x1a8] sm:$0xff]  ;;  %v374_v1 = vld [vmem:[%s1041_s3 + $0x120] sm:$0xff] }
  0x30   :  { %406 = vmatpush.msra.mxu0 %v349_v19  ;;  %426 = vmatpush.msra.mxu1 %v365_v20  ;;  %v340_v55 = vld [vmem:[%s1041_s3 + $0x10] sm:$0xff]  ;;  %v339_v63 = vld [vmem:[%s1041_s3 + $0x8] sm:$0xff]  ;;  %v390_v2 = vld [vmem:[%s1041_s3 + $0x1a0] sm:$0xff] }
  0x31   :  { %446 = vmatpush.msra.mxu2 %v381_v33  ;;  %466 = vmatpush.msra.mxu3 %v397_v34  ;;  %v356_v56 = vld [vmem:[%s1041_s3 + $0x90] sm:$0xff]  ;;  %v355_v0 = vld [vmem:[%s1041_s3 + $0x88] sm:$0xff]  ;;  %v338_v3 = vld [vmem:[%s1041_s3] sm:$0xff] }
  0x32   :  { %407 = vmatpush.msra.mxu0 %v348_v23  ;;  %427 = vmatpush.msra.mxu1 %v364_v24  ;;  %v354_v4 = vld [vmem:[%s1041_s3 + $0x80] sm:$0xff]  ;;  %v373_v5 = vld [vmem:[%s1041_s3 + $0x118] sm:$0xff]  ;;  %v372_v7 = vld [vmem:[%s1041_s3 + $0x110] sm:$0xff] }
  0x33   :  { %447 = vmatpush.msra.mxu2 %v380_v37  ;;  %467 = vmatpush.msra.mxu3 %v396_v38  ;;  %v389_v6 = vld [vmem:[%s1041_s3 + $0x198] sm:$0xff]  ;;  %v388_v8 = vld [vmem:[%s1041_s3 + $0x190] sm:$0xff]  ;;  %v371_v13 = vld [vmem:[%s1041_s3 + $0x108] sm:$0xff] }
  0x34   :  { %408 = vmatpush.msra.mxu0 %v347_v27  ;;  %428 = vmatpush.msra.mxu1 %v363_v28  ;;  %v387_v14 = vld [vmem:[%s1041_s3 + $0x188] sm:$0xff]  ;;  %v370_v18 = vld [vmem:[%s1041_s3 + $0x100] sm:$0xff] }
  0x35   :  { %448 = vmatpush.msra.mxu2 %v379_v41  ;;  %468 = vmatpush.msra.mxu3 %v395_v42  ;;  %v386_v19 = vld [vmem:[%s1041_s3 + $0x180] sm:$0xff] }
  0x36   :  { %409 = vmatpush.msra.mxu0 %v346_v31  ;;  %429 = vmatpush.msra.mxu1 %v362_v32 }
  0x37   :  { %449 = vmatpush.msra.mxu2 %v378_v45  ;;  %469 = vmatpush.msra.mxu3 %v394_v46 }
  0x38   :  { %410 = vmatpush.msra.mxu0 %v345_v35  ;;  %430 = vmatpush.msra.mxu1 %v361_v36 }
  0x39   :  { %450 = vmatpush.msra.mxu2 %v377_v49  ;;  %470 = vmatpush.msra.mxu3 %v393_v50 }
  0x3a   :  { %411 = vmatpush.msra.mxu0 %v344_v39  ;;  %431 = vmatpush.msra.mxu1 %v360_v40 }
  0x3b   :  { %451 = vmatpush.msra.mxu2 %v376_v53  ;;  %471 = vmatpush.msra.mxu3 %v392_v54 }
  0x3c   :  { %412 = vmatpush.msra.mxu0 %v343_v43  ;;  %432 = vmatpush.msra.mxu1 %v359_v44 }
  0x3d   :  { %452 = vmatpush.msra.mxu2 %v375_v59  ;;  %472 = vmatpush.msra.mxu3 %v391_v60 }
  0x3e   :  { %413 = vmatpush.msra.mxu0 %v342_v47  ;;  %433 = vmatpush.msra.mxu1 %v358_v48 }
  0x3f   :  { %453 = vmatpush.msra.mxu2 %v374_v1  ;;  %473 = vmatpush.msra.mxu3 %v390_v2 }
  0x40   :  { %414 = vmatpush.msra.mxu0 %v341_v51  ;;  %434 = vmatpush.msra.mxu1 %v357_v52 }
  0x41   :  { %454 = vmatpush.msra.mxu2 %v373_v5  ;;  %474 = vmatpush.msra.mxu3 %v389_v6 }
  0x42   :  { %415 = vmatpush.msra.mxu0 %v340_v55  ;;  %435 = vmatpush.msra.mxu1 %v356_v56 }
  0x43   :  { %455 = vmatpush.msra.mxu2 %v372_v7  ;;  %475 = vmatpush.msra.mxu3 %v388_v8 }
  0x44   :  { %416 = vmatpush.msra.mxu0 %v339_v63  ;;  %436 = vmatpush.msra.mxu1 %v355_v0 }
  0x45   :  { %456 = vmatpush.msra.mxu2 %v371_v13  ;;  %476 = vmatpush.msra.mxu3 %v387_v14 }
  0x46   :  { %417 = vmatpush.msra.mxu0 %v338_v3  ;;  %437 = vmatpush.msra.mxu1 %v354_v4 }
  0x47   :  { %457 = vmatpush.msra.mxu2 %v370_v18  ;;  %477 = vmatpush.msra.mxu3 %v386_v19 }
  0x83   :  { %v51_v57 = vpop.f32.mrf.mxu0  ;;  %v71_v58 = vpop.f32.mrf.mxu1 }
  0x84   :  { %v531_v61 = vmul.f32 -1.442695, %v51_v57  ;;  %v532_v62 = vmul.f32 -1.442695, %v71_v58 }
  0x86   :  { %539 = vpow2.f32 %v531_v61 }
  0x87   :  { %541 = vpow2.f32 %v532_v62 }
  0x8a   :  { %v91_v9 = vpop.f32.mrf.mxu2  ;;  %v111_v10 = vpop.f32.mrf.mxu3 }
  0x8b   :  { %v533_v11 = vmul.f32 -1.442695, %v91_v9  ;;  %v534_v12 = vmul.f32 -1.442695, %v111_v10  ;;  %v538_v10 = vld [vmem:[%s1042_s4] ss:$0 sm:$0xff] }
  0x8c   :  { %v540_v15 = vpop.eup %539  ;;  %s585_s4 = smov [#allocation2]  }
  0x8d   :  { %v542_v16 = vpop.eup %541  ;;  %v126_v17 = vadd.f32 1.0, %v540_v15  ;;  %543 = vpow2.f32 %v533_v11  ;;  %s516_s21 = sshll.u32 %s585_s4, 4  ;;  %s517_s21 = int_to_ptr.vmem [resolvable:$true] %s516_s21 }
  0x8e   :  { %v127_v20 = vadd.f32 1.0, %v542_v16  ;;  %545 = vpow2.f32 %v534_v12 }
  0x8f   :  { %547 = vrcp.f32 %v126_v17  ;;  %vm135_vm1 = vweird.f32 %v126_v17  ;;  %v141_v30 = vand.u32 2147483648, %v126_v17  ;;  %v139_v33 = vand.u32 2147483647, %v126_v17 }
  0x90   :  { %549 = vrcp.f32 %v127_v20  ;;  %v156_v34 = vand.u32 2147483648, %v127_v20  ;;  %vm150_vm3 = vweird.f32 %v127_v20  ;;  %v154_v36 = vand.u32 2147483647, %v127_v20 }
  0x91   :  { %v142_v40 = vor.u32 1.1754944e-38, %v141_v30  ;;  %vm140_vm6 = vcmp.eq.f32.partialorder %v139_v33, 8.507059e+37 }
  0x92   :  { %v157_v44 = vor.u32 1.1754944e-38, %v156_v34  ;;  %vm155_vm8 = vcmp.eq.f32.partialorder %v154_v36, 8.507059e+37 }
  0x93   :  { %v544_v21 = vpop.eup %543 }
  0x94   :  { %v546_v22 = vpop.eup %545  ;;  %v128_v23 = vadd.f32 1.0, %v544_v21 }
  0x95   :  { %v548_v24 = vpop.eup %547  ;;  %v129_v25 = vadd.f32 1.0, %v546_v22 }
  0x96   :  { %v550_v26 = vpop.eup %549  ;;  %551 = vrcp.f32 %v128_v23  ;;  %v131_v27 = vmul.f32 %v548_v24, %v126_v17  ;;  %vm136_vm2 = vweird.f32 %v548_v24  ;;  %v171_v50 = vand.u32 2147483648, %v128_v23 }
  0x97   :  { %553 = vrcp.f32 %v129_v25  ;;  %v146_v28 = vmul.f32 %v550_v26, %v127_v20  ;;  %vm151_vm4 = vweird.f32 %v550_v26  ;;  %vm137_vm5 = vmor %vm135_vm1, %vm136_vm2  ;;  %v169_v53 = vand.u32 2147483647, %v128_v23 }
  0x98   :  { %v132_v29 = vsub.f32 1.0, %v131_v27  ;;  %vm152_vm7 = vmor %vm150_vm3, %vm151_vm4  ;;  %v186_v54 = vand.u32 2147483648, %v129_v25  ;;  %v184_v56 = vand.u32 2147483647, %v129_v25  ;;  %vm165_vm11 = vweird.f32 %v128_v23 }
  0x99   :  { %v147_v31 = vsub.f32 1.0, %v146_v28  ;;  %v172_v58 = vor.u32 1.1754944e-38, %v171_v50  ;;  %vm180_vm13 = vweird.f32 %v129_v25  ;;  %vm170_vm14 = vcmp.eq.f32.partialorder %v169_v53, 8.507059e+37 }
  0x9a   :  { %v133_v32 = vmul.f32 %v548_v24, %v132_v29  ;;  %v187_v61 = vor.u32 1.1754944e-38, %v186_v54  ;;  %vm185_vm1 = vcmp.eq.f32.partialorder %v184_v56, 8.507059e+37 }
  0x9b   :  { %v148_v35 = vmul.f32 %v550_v26, %v147_v31 }
  0x9c   :  { %v552_v37 = vpop.eup %551  ;;  %v134_v38 = vadd.f32 %v548_v24, %v133_v32 }
  0x9d   :  { %v554_v39 = vpop.eup %553  ;;  %v149_v41 = vadd.f32 %v550_v26, %v148_v35  ;;  %v161_v42 = vmul.f32 %v552_v37, %v128_v23  ;;  %vm166_vm9 = vweird.f32 %v552_v37 }
  0x9e   :  { %v138_v43 = vsel %vm137_vm5, %v548_v24, %v134_v38  ;;  %v176_v45 = vmul.f32 %v554_v39, %v129_v25  ;;  %vm181_vm10 = vweird.f32 %v554_v39  ;;  %vm167_vm12 = vmor %vm165_vm11, %vm166_vm9 }
  0x9f   :  { %v143_v46 = vsel %vm140_vm6, %v142_v40, %v138_v43  ;;  %v153_v47 = vsel %vm152_vm7, %v550_v26, %v149_v41  ;;  %v162_v48 = vsub.f32 1.0, %v161_v42  ;;  %vm182_vm15 = vmor %vm180_vm13, %vm181_vm10 }
  0xa0   :  { %270 = vmatmul.f32.vlgmr.msrb.gmra.mxu0 %v143_v46  ;;  %v158_v49 = vsel %vm155_vm8, %v157_v44, %v153_v47  ;;  %v177_v51 = vsub.f32 1.0, %v176_v45  ;;  %v334_v62 = vmul.f32 %v143_v46, %v143_v46 }
  0xa1   :  { %290 = vmatmul.f32.vlgmr.msrb.gmra.mxu1 %v158_v49  ;;  %v163_v52 = vmul.f32 %v552_v37, %v162_v48  ;;  %v335_v1 = vmul.f32 %v158_v49, %v158_v49 }
  0xa2   :  { %v178_v55 = vmul.f32 %v554_v39, %v177_v51 }
  0xa3   :  { %v164_v57 = vadd.f32 %v552_v37, %v163_v52 }
  0xa4   :  { %v179_v59 = vadd.f32 %v554_v39, %v178_v55 }
  0xa5   :  { %v168_v60 = vsel %vm167_vm12, %v552_v37, %v164_v57 }
  0xa6   :  { %v173_v63 = vsel %vm170_vm14, %v172_v58, %v168_v60  ;;  %v183_v0 = vsel %vm182_vm15, %v554_v39, %v179_v59 }
  0xa7   :  { %310 = vmatmul.f32.vlgmr.msrb.gmra.mxu2 %v173_v63  ;;  %v188_v2 = vsel %vm185_vm1, %v187_v61, %v183_v0  ;;  %v336_v3 = vmul.f32 %v173_v63, %v173_v63 }
  0xa8   :  { %330 = vmatmul.f32.vlgmr.msrb.gmra.mxu3 %v188_v2  ;;  %418 = vmatmul.f32.vlgmr.msra.gmra.mxu0 %v334_v62  ;;  %v337_v4 = vmul.f32 %v188_v2, %v188_v2 }
  0xa9   :  { %438 = vmatmul.f32.vlgmr.msra.gmra.mxu1 %v335_v1 }
  0xaf   :  { %458 = vmatmul.f32.vlgmr.msra.gmra.mxu2 %v336_v3 }
  0xb0   :  { %478 = vmatmul.f32.vlgmr.msra.gmra.mxu3 %v337_v4 }
 0x11d   :  { %v271_v5 = vpop.f32.mrf.mxu0 }
 0x11e   :  { %v291_v6 = vpop.f32.mrf.mxu1 }
 0x11f   :  { %v292_v7 = vadd.f32 %v291_v6, %v271_v5 }
 0x125   :  { %v419_v16 = vpop.f32.mrf.mxu0 }
 0x126   :  { %v439_v17 = vpop.f32.mrf.mxu1 }
 0x127   :  { %v440_v19 = vadd.f32 %v439_v17, %v419_v16 }
 0x12a   :  { %v311_v8 = vpop.f32.mrf.mxu2 }
 0x12b   :  { %v312_v9 = vadd.f32 %v311_v8, %v292_v7  ;;  %v331_v11 = vpop.f32.mrf.mxu3 }
 0x12d   :  { %v332_v12 = vadd.f32 %v331_v11, %v312_v9 }
 0x12f   :  { %v499_v13 = vmul.f32 %v538_v10, %v332_v12  ;;  %v482_v23 = vmul.f32 %v332_v12, %v332_v12 }
 0x131   :  { %501 = vrot.lane.b32.xlu0 %v499_v13, %s583_s19 }
 0x132   :  { %v459_v18 = vpop.f32.mrf.mxu2 }
 0x133   :  { %v460_v20 = vadd.f32 %v459_v18, %v440_v19  ;;  %v479_v21 = vpop.f32.mrf.mxu3 }
 0x135   :  { %v480_v22 = vadd.f32 %v479_v21, %v460_v20 }
 0x137   :  { %v483_v24 = vsub.f32 %v480_v22, %v482_v23 }
 0x139   :  { %v484_v25 = vadd.f32 0.01, %v483_v24 }
 0x13b   :  { %555 = vrsqrt.f32 %v484_v25  ;;  %vm491_vm3 = vweird.f32 %v484_v25 }
 0x141   :  { %v556_v26 = vpop.eup %555 }
 0x142   :  { %v486_v27 = vmul.f32 %v556_v26, %v484_v25  ;;  %vm492_vm2 = vweird.f32 %v556_v26 }
 0x143   :  { %vm493_vm4 = vmor %vm491_vm3, %vm492_vm2 }
 0x144   :  { %v487_v28 = vmul.f32 %v556_v26, %v486_v27 }
 0x146   :  { %v488_v29 = vmul.f32 0.5, %v487_v28 }
 0x148   :  { %v489_v30 = vsub.f32 1.5, %v488_v29 }
 0x14a   :  { %v490_v31 = vmul.f32 %v556_v26, %v489_v30 }
 0x14c   :  { %v494_v33 = vsel %vm493_vm4, %v556_v26, %v490_v31 }
 0x1a3   :  { %v502_v14 = vpop.permute.xlu0 %501 }
 0x1a4   :  { %v504_v15 = vsub.f32 %v332_v12, %v502_v14 }
 0x1a6   :  { %506 = vrot.lane.b32.xlu0 %v504_v15, %s584_s20 }
 0x218   :  { %v507_v32 = vpop.permute.xlu0 %506 }
 0x219   :  { %v509_v34 = vmul.f32 %v507_v32, %v494_v33 }
 0x21b   :  { %510 = vst.msk [vmem:[#allocation2] sm:$0xff] %vm30_vm0, %v509_v34 }
 0x21c   :  { %521 = dma.vmem_to_hbm [thread:$0]  %s517_s21, 128, %s519_s23, [#allocation3]  }
 0x21d   :  { %581 = dma.done.wait [#allocation3], 128  }
 0x21e   :  { %582 = vsyncadd [#allocation3], 4294967168 }
 0x21f   :  { %526 = vsyncpa [#allocation3], 1 }

</bundles_post_ra>
